<compile_context>
chip_gen: v7x
topology: tpu7x:2x2x1
jax: 0.10.0
libtpu: 0.0.40
codegen_flags: <defaults>
</compile_context>

<pallas_src>
import jax
import jax.numpy as jnp
from jax.experimental import pallas as pl
from jax.experimental.pallas import tpu as pltpu


def _round_up(a, b):
    return (a + b - 1) // b * b


def abae_kernel(x_ref, mt_ref, wt_ref, b_ref, o_ref):
    """One batch tile, fully resident in VMEM.

    x_ref : [TB, S, E]   (f32 or bf16) input tile, streamed from HBM
    mt_ref: [E, E]       bf16  attention matrix transposed (M.T), resident
    wt_ref: [E, O_pad]   bf16  linear weight transposed (W_lin.T), resident
    b_ref : [1, O_pad]   f32   linear bias (-1e30 in padded columns), resident
    o_ref : [TB, O_pad]  f32   output probabilities (padded cols are 0)
    """
    x = x_ref[...].astype(jnp.float32)                       # [TB, S, E]
    seq_len = x.shape[1]

    # mean over the sentence (constant multiply, not a divide)
    avg = jnp.sum(x, axis=1) * (1.0 / seq_len)                # [TB, E]

    # attention logit: avg @ M.T on the MXU (bf16 operands, f32 accumulate)
    logit = jnp.dot(avg.astype(jnp.bfloat16), mt_ref[...],
                    preferred_element_type=jnp.float32)       # [TB, E]

    # per-token attention score d = <x_t, logit>   (VPU mul + XLU reduce)
    d = jnp.sum(x * logit[:, None, :], axis=2)                # [TB, S]

    # attention softmax over the sentence dim (exp + approx recip on EUP)
    d = d - jnp.max(d, axis=1, keepdims=True)
    ed = jnp.exp(d)
    att = ed * pl.reciprocal(jnp.sum(ed, axis=1, keepdims=True), approx=True)

    # attention-weighted sentence embedding
    sent = jnp.sum(x * att[:, :, None], axis=1)               # [TB, E]

    # final linear layer (MXU) + bias; padded bias columns are -1e30
    z = jnp.dot(sent.astype(jnp.bfloat16), wt_ref[...],
                preferred_element_type=jnp.float32) + b_ref[...]   # [TB, O_pad]

    # output softmax (output_dim > 1 branch), exact divide (tiny, off the
    # memory-bound critical path); padded columns give exp(-1e30 - max) == 0.
    z = z - jnp.max(z, axis=1, keepdims=True)
    ez = jnp.exp(z)
    o_ref[...] = ez / jnp.sum(ez, axis=1, keepdims=True)


def _vmem_limit_bytes():
    """Generation-aware scoped-VMEM limit (~60% of physical, capped)."""
    try:
        cap = int(pltpu.get_tpu_info().vmem_capacity_bytes)
    except Exception:
        cap = 64 * 1024 * 1024          # conservative default (v7x-sized)
    return cap, min(int(cap * 0.6), 96 * 1024 * 1024)


def _choose_batch_tile(B, S, E, x_itemsize, O_pad, vmem_limit):
    """Pick the batch tile so pipeline buffers + in-body temporaries fit."""
    # Per batch row of a tile:
    #   2 pipeline buffers of the streamed x dtype
    #   ~3 full-tile f32 temporaries (x upcast, x*logit, x*att)
    per_row = 2 * S * E * x_itemsize + 3 * S * E * 4
    # Resident weights (count 2 buffers each to be safe) + fixed slack.
    weights = 2 * (E * E * 2 + E * O_pad * 2 + O_pad * 4)
    budget = vmem_limit - weights - (4 << 20)
    tb = max(1, budget // per_row)
    if B > 8:
        # keep >=4 grid steps so v7x's 2 TCs and the double buffer have work
        tb = min(tb, pl.cdiv(B, 4))
    if tb >= B:
        return B, per_row, weights
    tb = max(8, (tb // 8) * 8)          # 8-align the output block sublane dim
    return min(tb, B), per_row, weights


def abae_forward(x, attention_matrix, lin_weight, lin_bias):
    """Wrapper: weight layout plumbing + pallas_call.  x is streamed as-is."""
    B, S, E = x.shape
    O = lin_weight.shape[0]

    # ---- resident weights: transpose, bf16, lane-dense O padding ----------
    O_pad = _round_up(O, 128)
    m_t = attention_matrix.T.astype(jnp.bfloat16)             # [E, E]
    w_t = lin_weight.T.astype(jnp.bfloat16)                   # [E, O]
    b2d = lin_bias.reshape(1, O).astype(jnp.float32)          # [1, O]
    if O_pad != O:
        w_t = jnp.pad(w_t, ((0, 0), (0, O_pad - O)))          # zero columns
        # -1e30 bias in padded columns => exp() underflows to exactly 0,
        # so the output softmax normalization only sees the real columns.
        b2d = jnp.pad(b2d, ((0, 0), (0, O_pad - O)),
                      constant_values=-1e30)

    # ---- VMEM budgeting / batch tiling (no HBM padding of x) --------------
    vmem_cap, vmem_limit = _vmem_limit_bytes()
    tb, per_row, weights_bytes = _choose_batch_tile(
        B, S, E, x.dtype.itemsize, O_pad, vmem_limit)
    required = tb * per_row + weights_bytes + (4 << 20)
    vmem_limit = min(max(vmem_limit, required), max(vmem_cap - (8 << 20),
                                                    16 << 20))

    grid = (pl.cdiv(B, tb),)

    out = pl.pallas_call(
        abae_kernel,
        out_shape=jax.ShapeDtypeStruct((B, O_pad), jnp.float32),
        grid=grid,
        in_specs=[
            # x: batch-tiled stream; trailing dims are the full (S, E)
            pl.BlockSpec((tb, S, E), lambda i: (i, 0, 0)),
            pl.BlockSpec((E, E), lambda i: (0, 0)),            # M.T resident
            pl.BlockSpec((E, O_pad), lambda i: (0, 0)),        # W.T resident
            pl.BlockSpec((1, O_pad), lambda i: (0, 0)),        # bias resident
        ],
        out_specs=pl.BlockSpec((tb, O_pad), lambda i: (i, 0)),
        compiler_params=pltpu.CompilerParams(
            dimension_semantics=("parallel",),
            vmem_limit_bytes=int(vmem_limit),
        ),
    )(x, m_t, w_t, b2d)

    return out[:, :O]


def abae_reference(x, attention_matrix, lin_weight, lin_bias):
    """Pure-JAX f32 reference mirroring the PyTorch forward."""
    S = x.shape[1]
    avg = jnp.sum(x, axis=1) / S
    logit = (attention_matrix @ avg.T).T
    d = jnp.squeeze(x @ logit[:, :, None], axis=-1)
    d = d - jnp.max(d, axis=1, keepdims=True)
    att = jnp.exp(d) / jnp.sum(jnp.exp(d), axis=1, keepdims=True)
    sent = jnp.sum(x * att[:, :, None], axis=1)
    z = sent @ lin_weight.T + lin_bias
    z = z - jnp.max(z, axis=1, keepdims=True)
    return jnp.exp(z) / jnp.sum(jnp.exp(z), axis=1, keepdims=True)


if __name__ == "__main__":
    # Small shapes consistent with the module: batch=2, seq=8, embedding=32, out=4
    B, S, E, O = 2, 8, 32, 4

    key = jax.random.PRNGKey(0)
    kx, km, kw, kb = jax.random.split(key, 4)

    x = jax.random.normal(kx, (B, S, E), dtype=jnp.float32)

    # attention_matrix = torch.rand((E, E))  -> uniform [0, 1)
    attention_matrix = jax.random.uniform(km, (E, E), dtype=jnp.float32)

    # nn.Linear(E, O): weight [O, E], bias [O]
    bound = 1.0 / jnp.sqrt(E)
    lin_weight = jax.random.uniform(kw, (O, E), minval=-bound, maxval=bound,
                                    dtype=jnp.float32)
    lin_bias = jax.random.uniform(kb, (O,), minval=-bound, maxval=bound,
                                  dtype=jnp.float32)

    out = abae_forward(x, attention_matrix, lin_weight, lin_bias)
    out = jax.block_until_ready(out)

    ref = abae_reference(x, attention_matrix, lin_weight, lin_bias)
    assert out.shape == (B, O)
    # bf16 MXU operands + EUP approx reciprocal (attention softmax) vs f32 ref.
    assert jnp.allclose(out, ref, atol=5e-2, rtol=5e-2), "mismatch vs reference"
    # Output softmax uses an exact divide, so rows sum to 1 tightly.
    assert jnp.allclose(jnp.sum(out, axis=1), 1.0, atol=1e-3)

    print("KERNEL_OK")
</pallas_src>

<mosaic_0001>
module attributes {stable_mosaic.version = 11 : i64} {
  func.func @abae_kernel(%arg0: i32, %arg1: memref<2x8x32xf32, #tpu.memory_space<vmem>>, %arg2: memref<32x32xbf16, #tpu.memory_space<vmem>>, %arg3: memref<32x128xbf16, #tpu.memory_space<vmem>>, %arg4: memref<1x128xf32, #tpu.memory_space<vmem>>, %arg5: memref<2x128xf32, #tpu.memory_space<vmem>>) attributes {dimension_semantics = [#tpu.dimension_semantics<parallel>], iteration_bounds = array<i64: 1>, scalar_prefetch = 0 : i64, scratch_operands = 0 : i64, tpu.core_type = #tpu.core_type<tc>, window_params = [{transform_indices = @transform_0, window_bounds = array<i64: 2, 8, 32>}, {pipeline_mode = #tpu.pipeline_mode<synchronous>, transform_indices = @transform_1, window_bounds = array<i64: 32, 32>}, {pipeline_mode = #tpu.pipeline_mode<synchronous>, transform_indices = @transform_2, window_bounds = array<i64: 32, 128>}, {pipeline_mode = #tpu.pipeline_mode<synchronous>, transform_indices = @transform_3, window_bounds = array<i64: 1, 128>}, {transform_indices = @transform_4, window_bounds = array<i64: 2, 128>}]} {
    %c0 = arith.constant 0 : index
    %c0_0 = arith.constant 0 : index
    %c0_1 = arith.constant 0 : index
    %0 = vector.load %arg1[%c0, %c0_0, %c0_1] : memref<2x8x32xf32, #tpu.memory_space<vmem>>, vector<2x8x32xf32>
    %cst = arith.constant dense<0.000000e+00> : vector<2x32xf32>
    %1 = vector.multi_reduction <add>, %0, %cst [1] : vector<2x8x32xf32> to vector<2x32xf32>
    %cst_2 = arith.constant 1.250000e-01 : f32
    %2 = vector.broadcast %cst_2 : f32 to vector<2x32xf32>
    %3 = arith.mulf %1, %2 : vector<2x32xf32>
    %4 = arith.truncf %3 : vector<2x32xf32> to vector<2x32xbf16>
    %c0_3 = arith.constant 0 : index
    %c0_4 = arith.constant 0 : index
    %5 = vector.load %arg2[%c0_3, %c0_4] : memref<32x32xbf16, #tpu.memory_space<vmem>>, vector<32x32xbf16>
    %cst_5 = arith.constant dense<0.000000e+00> : vector<2x32xf32>
    %6 = tpu.matmul %4, %5, %cst_5 {dimension_numbers = #tpu.dot_dimension_numbers<[1], [0], [0], [1], [0, 0, 1, 1], [], []>} : vector<2x32xbf16>, vector<32x32xbf16>, vector<2x32xf32> -> vector<2x32xf32>
    %7 = vector.shape_cast %6 : vector<2x32xf32> to vector<2x1x32xf32>
    %8 = vector.broadcast %7 : vector<2x1x32xf32> to vector<2x8x32xf32>
    %9 = arith.mulf %0, %8 : vector<2x8x32xf32>
    %cst_6 = arith.constant dense<0.000000e+00> : vector<2x8xf32>
    %10 = vector.multi_reduction <add>, %9, %cst_6 [2] : vector<2x8x32xf32> to vector<2x8xf32>
    %cst_7 = arith.constant dense<0xFF800000> : vector<2xf32>
    %11 = vector.multi_reduction <maximumf>, %10, %cst_7 [1] : vector<2x8xf32> to vector<2xf32>
    %12 = vector.shape_cast %11 : vector<2xf32> to vector<2x1xf32>
    %13 = vector.broadcast %12 : vector<2x1xf32> to vector<2x8xf32>
    %14 = arith.subf %10, %13 : vector<2x8xf32>
    %15 = math.exp %14 : vector<2x8xf32>
    %cst_8 = arith.constant dense<0.000000e+00> : vector<2xf32>
    %16 = vector.multi_reduction <add>, %15, %cst_8 [1] : vector<2x8xf32> to vector<2xf32>
    %17 = vector.shape_cast %16 : vector<2xf32> to vector<2x1xf32>
    %18 = tpu.reciprocal %17 {approx = true} : vector<2x1xf32> -> vector<2x1xf32>
    %19 = vector.broadcast %18 : vector<2x1xf32> to vector<2x8xf32>
    %20 = arith.mulf %15, %19 : vector<2x8xf32>
    %21 = vector.shape_cast %20 : vector<2x8xf32> to vector<2x8x1xf32>
    %22 = vector.broadcast %21 : vector<2x8x1xf32> to vector<2x8x32xf32>
    %23 = arith.mulf %0, %22 : vector<2x8x32xf32>
    %cst_9 = arith.constant dense<0.000000e+00> : vector<2x32xf32>
    %24 = vector.multi_reduction <add>, %23, %cst_9 [1] : vector<2x8x32xf32> to vector<2x32xf32>
    %25 = arith.truncf %24 : vector<2x32xf32> to vector<2x32xbf16>
    %c0_10 = arith.constant 0 : index
    %c0_11 = arith.constant 0 : index
    %26 = vector.load %arg3[%c0_10, %c0_11] : memref<32x128xbf16, #tpu.memory_space<vmem>>, vector<32x128xbf16>
    %cst_12 = arith.constant dense<0.000000e+00> : vector<2x128xf32>
    %27 = tpu.matmul %25, %26, %cst_12 {dimension_numbers = #tpu.dot_dimension_numbers<[1], [0], [0], [1], [0, 0, 1, 1], [], []>} : vector<2x32xbf16>, vector<32x128xbf16>, vector<2x128xf32> -> vector<2x128xf32>
    %c0_13 = arith.constant 0 : index
    %c0_14 = arith.constant 0 : index
    %28 = vector.load %arg4[%c0_13, %c0_14] : memref<1x128xf32, #tpu.memory_space<vmem>>, vector<1x128xf32>
    %29 = vector.broadcast %28 : vector<1x128xf32> to vector<2x128xf32>
    %30 = arith.addf %27, %29 : vector<2x128xf32>
    %cst_15 = arith.constant dense<0xFF800000> : vector<2xf32>
    %31 = vector.multi_reduction <maximumf>, %30, %cst_15 [1] : vector<2x128xf32> to vector<2xf32>
    %32 = vector.shape_cast %31 : vector<2xf32> to vector<2x1xf32>
    %33 = vector.broadcast %32 : vector<2x1xf32> to vector<2x128xf32>
    %34 = arith.subf %30, %33 : vector<2x128xf32>
    %35 = math.exp %34 : vector<2x128xf32>
    %cst_16 = arith.constant dense<0.000000e+00> : vector<2xf32>
    %36 = vector.multi_reduction <add>, %35, %cst_16 [1] : vector<2x128xf32> to vector<2xf32>
    %37 = vector.shape_cast %36 : vector<2xf32> to vector<2x1xf32>
    %38 = vector.broadcast %37 : vector<2x1xf32> to vector<2x128xf32>
    %39 = arith.divf %35, %38 : vector<2x128xf32>
    %c0_17 = arith.constant 0 : index
    %c0_18 = arith.constant 0 : index
    %40 = vector.load %arg5[%c0_17, %c0_18] : memref<2x128xf32, #tpu.memory_space<vmem>>, vector<2x128xf32>
    tpu.vector_store %arg5[%c0_17, %c0_18], %39 {strides = array<i32>} : memref<2x128xf32, #tpu.memory_space<vmem>>, vector<2x128xf32>,
    return
  }
  func.func @transform_0(%arg0: i32) -> (i32, i32, i32) {
    %c0_i32 = arith.constant 0 : i32
    %c0_i32_0 = arith.constant 0 : i32
    %c0_i32_1 = arith.constant 0 : i32
    return %arg0, %c0_i32, %c0_i32_0 : i32, i32, i32
  }
  func.func @transform_1(%arg0: i32) -> (i32, i32) {
    %c0_i32 = arith.constant 0 : i32
    %c0_i32_0 = arith.constant 0 : i32
    %c0_i32_1 = arith.constant 0 : i32
    return %c0_i32, %c0_i32_0 : i32, i32
  }
  func.func @transform_2(%arg0: i32) -> (i32, i32) {
    %c0_i32 = arith.constant 0 : i32
    %c0_i32_0 = arith.constant 0 : i32
    %c0_i32_1 = arith.constant 0 : i32
    return %c0_i32, %c0_i32_0 : i32, i32
  }
  func.func @transform_3(%arg0: i32) -> (i32, i32) {
    %c0_i32 = arith.constant 0 : i32
    %c0_i32_0 = arith.constant 0 : i32
    %c0_i32_1 = arith.constant 0 : i32
    return %c0_i32, %c0_i32_0 : i32, i32
  }
  func.func @transform_4(%arg0: i32) -> (i32, i32) {
    %c0_i32 = arith.constant 0 : i32
    %c0_i32_0 = arith.constant 0 : i32
    return %arg0, %c0_i32 : i32, i32
  }
}

</mosaic_0001>

<bundles_post_ra>
// kernel: tpu_custom_call.1
= control target key start
LH: loop header
LB: loop body
LE: loop exit
PB: predicated region body
PF: predicated region fallthrough
CT: control target
= control target key end

     0   :  { %9 = vsyncpa [#allocation3], 0  ;;  %s662_s0 = inlined_call_operand.hbm [shape: f32[2,8,32], index: 0, kind: input, shape index: {}]   ;;  %s663_s1 = inlined_call_operand.hbm [shape: bf16[32,32], index: 1, kind: input, shape index: {}]   ;;  %s664_s2 = inlined_call_operand.hbm [shape: bf16[32,128], index: 2, kind: input, shape index: {}]   ;;  %s665_s3 = inlined_call_operand.vmem [shape: f32[1,128], index: 3, kind: input, shape index: {}]   ;;  %s666_s4 = inlined_call_operand.hbm [shape: f32[2,128], index: 4, kind: output, shape index: {}]  }
   0x1   :  { %10 = vsyncpa [#allocation6], 0 }
   0x2   :  { %11 = vsyncpa [#allocation4], 0  ;;  %s538_s15 = smov [#allocation5]   ;;  %s444_s19 = scalar_lea.hbm %s663_s1, 256 }
   0x3   :  { %s29_s16 = sshll.u32 %s538_s15, 4  ;;  %p445_p0 = scmp.ne.s32.totalorder %s663_s1, %s444_s19  ;;  %s30_s16 = int_to_ptr.vmem [resolvable:$true] %s29_s16 }
   0x4   :  { %p448_p1 = scmp.lt.u32.totalorder %s444_s19, %s663_s1 }
   0x6   :  { %p450_p2 = pnand %p448_p1, %p445_p0 }
   0x8   :  { %453 = shalt.err (!%p450_p2)
}
   0x9   :  { %s454_s24 = scalar_lea.vmem %s30_s16, 256  ;;  %p459_p4 = scmp.lt.s32.totalorder %s30_s16, %s30_s16 }
   0xa   :  { %p455_p3 = scmp.ne.s32.totalorder %s30_s16, %s454_s24  ;;  %p460_p5 = scmp.lt.s32.totalorder %s454_s24, %s454_s24 }
   0xc   :  { %p461_p6 = por %p460_p5, %p459_p4 }
   0xe   :  { %p462_p7 = pnand %p461_p6, %p455_p3 }
  0x10   :  { %465 = shalt.err (!%p462_p7)
}
  0x11   :  { %s539_s25 = smov 64   ;;  %s540_s26 = smov 4  }
  0x12   :  { %35 = dma.hbm_to_vmem [thread:$0]  %s663_s1, 256, %s30_s16, [#allocation6], %s539_s25, %s539_s25, %s540_s26  }
  0x13   :  { %s541_s29 = smov [#allocation2]   ;;  %s466_s7 = scalar_lea.hbm %s662_s0, 256 }
  0x14   :  { %s17_s30 = sshll.u32 %s541_s29, 4  ;;  %p467_p8 = scmp.ne.s32.totalorder %s662_s0, %s466_s7  ;;  %s18_s30 = int_to_ptr.vmem [resolvable:$true] %s17_s30 }
  0x15   :  { %p470_p9 = scmp.lt.u32.totalorder %s466_s7, %s662_s0 }
  0x17   :  { %p472_p10 = pnand %p470_p9, %p467_p8 }
  0x19   :  { %475 = shalt.err (!%p472_p10)
}
  0x1a   :  { %s476_s12 = scalar_lea.vmem %s18_s30, 256  ;;  %p481_p12 = scmp.lt.s32.totalorder %s18_s30, %s18_s30 }
  0x1b   :  { %p477_p11 = scmp.ne.s32.totalorder %s18_s30, %s476_s12  ;;  %p482_p13 = scmp.lt.s32.totalorder %s476_s12, %s476_s12 }
  0x1d   :  { %p483_p0 = por %p482_p13, %p481_p12 }
  0x1f   :  { %p484_p1 = pnand %p483_p0, %p477_p11 }
  0x21   :  { %487 = shalt.err (!%p484_p1)
}
  0x22   :  { %s542_s1 = smov 128   ;;  %s543_s13 = smov 8  }
  0x23   :  { %23 = dma.hbm_to_vmem [thread:$0]  %s662_s0, 256, %s18_s30, [#allocation3], %s542_s1, %s542_s1, %s543_s13  }
  0x24   :  { %s544_s16 = smov [#allocation7]   ;;  %s488_s20 = scalar_lea.hbm %s664_s2, 256 }
  0x25   :  { %s41_s17 = sshll.u32 %s544_s16, 4  ;;  %p489_p2 = scmp.ne.s32.totalorder %s664_s2, %s488_s20  ;;  %s42_s17 = int_to_ptr.vmem [resolvable:$true] %s41_s17 }
  0x26   :  { %p492_p3 = scmp.lt.u32.totalorder %s488_s20, %s664_s2 }
  0x28   :  { %p494_p4 = pnand %p492_p3, %p489_p2 }
  0x2a   :  { %497 = shalt.err (!%p494_p4)
}
  0x2b   :  { %s498_s27 = scalar_lea.vmem %s42_s17, 256  ;;  %p503_p6 = scmp.lt.s32.totalorder %s42_s17, %s42_s17 }
  0x2c   :  { %p499_p5 = scmp.ne.s32.totalorder %s42_s17, %s498_s27  ;;  %p504_p7 = scmp.lt.s32.totalorder %s498_s27, %s498_s27 }
  0x2e   :  { %p505_p8 = por %p504_p7, %p503_p6 }
  0x30   :  { %p506_p9 = pnand %p505_p8, %p499_p5 }
  0x32   :  { %509 = shalt.err (!%p506_p9)
}
  0x33   :  { %47 = dma.hbm_to_vmem [thread:$0]  %s664_s2, 256, %s42_s17, [#allocation6], %s539_s25, %s539_s25, %s540_s26  }
  0x34   :  { %532 = dma.done.wait [#allocation3], 256  }
  0x35   :  { %533 = vsyncadd [#allocation3], 4294967040 }
  0x36   :  { %534 = dma.done.wait [#allocation6], 512  }
  0x37   :  { %535 = vsyncadd [#allocation6], 4294966784  ;;  %v545_v0 = vmov 0.0   ;;  %vm546_vm0 = vmmov 0   ;;  %v430_v1 = vld [vmem:[#allocation5] sm:$0xff]   ;;  %vm62_vm1 = vcmask 261120   ;;  %v151_v29 = vlaneseq }
  0x38   :  { %400 = vmatprep.subr.bf16.mxu0 %v545_v0  ;;  %404 = vmatprep.mubr.msk.bf16.mxu0 %vm546_vm0, %v545_v0  ;;  %v431_v2 = vld [vmem:[#allocation5 + $0x8] sm:$0xff]   ;;  %v621_v3 = vld [vmem:[#allocation2] sm:$0xff]  ;;  %v623_v4 = vld [vmem:[#allocation2 + $0x8] sm:$0xff]  ;;  %vm89_vm2 = vcmask 1041409   ;;  %v547_v27 = vmov 1966171168  }
  0x39   :  { %408 = vmatprep.subr.bf16.mxu1 %v545_v0  ;;  %412 = vmatprep.mubr.msk.bf16.mxu1 %vm546_vm0, %v545_v0  ;;  %v63_v5 = vsel %vm62_vm1, %v621_v3, 0.0  ;;  %v70_v6 = vsel %vm62_vm1, %v623_v4, 0.0  ;;  %v149_v28 = vunpack.c.l.s4 %v547_v27  ;;  %v152_v31 = vshrl.u32 %v151_v29, 7  ;;  %s549_s26 = smov [#allocation8]  }
  0x3a   :  { %401 = vmatpush3.bf16.msra.mxu0 %v430_v1  ;;  %v64_v7 = vrot.slane %v63_v5, 4  ;;  %v71_v8 = vrot.slane %v70_v6, 4  ;;  %v191_v48 = vand.u32 127, %v151_v29  ;;  %vm202_vm3 = vcmask 58368   ;;  %s377_s29 = sshll.u32 %s549_s26, 4  ;;  %s378_s29 = int_to_ptr.vmem [resolvable:$true] %s377_s29 }
  0x3b   :  { %402 = vmatprep.subr.bf16.mxu0 %v545_v0  ;;  %v150_v30 = vunpack.c.0.s8 %v149_v28  ;;  %v172_v36 = vsub.s32 0, %v152_v31  ;;  %v548_v56 = vmov 0   ;;  %v213_v57 = vsub.s32 1, %v152_v31  ;;  %p515_p11 = scmp.lt.s32.totalorder %s378_s29, %s378_s29 }
  0x3c   :  { %v65_v9 = vadd.f32 %v64_v7, %v63_v5  ;;  %v72_v10 = vadd.f32 %v71_v8, %v70_v6  ;;  %v194_v50 = vsub.s32 %v191_v48, %v152_v31  ;;  %429 = vset.pattern.permute.xlu0 %v548_v56  ;;  %428 = vset.pattern.permute.xlu1 %v548_v56  ;;  %vm358_vm4 = vcmask 1041408  }
  0x3d   :  { %v153_v32 = vsub.s32 %v150_v30, %v152_v31 }
  0x3e   :  { %403 = vmatpush3.bf16.msra.mxu0 %v431_v2  ;;  %v66_v11 = vrot.slane %v65_v9, 2  ;;  %v73_v12 = vrot.slane %v72_v10, 2 }
  0x40   :  { %v67_v13 = vadd.f32 %v66_v11, %v65_v9  ;;  %v74_v14 = vadd.f32 %v73_v12, %v72_v10 }
  0x42   :  { %v68_v15 = vrot.slane %v67_v13, 1  ;;  %v75_v16 = vrot.slane %v74_v14, 1 }
  0x44   :  { %v69_v17 = vadd.f32 %v68_v15, %v67_v13  ;;  %v76_v18 = vadd.f32 %v75_v16, %v74_v14 }
  0x46   :  { %v77_v19 = vmul.f32 0.125, %v69_v17  ;;  %v78_v20 = vmul.f32 0.125, %v76_v18  ;;  %v432_v18 = vld [vmem:[#allocation7] sm:$0xff]  }
  0x47   :  { %409 = vmatpush3.bf16.msra.mxu1 %v432_v18 }
  0x48   :  { %v79_v21 = vpack.c.bf16 %v77_v19, %v77_v19  ;;  %v80_v22 = vpack.c.bf16 %v78_v20, %v78_v20  ;;  %410 = vmatprep.subr.bf16.mxu1 %v545_v0  ;;  %v433_v19 = vld [vmem:[#allocation7 + $0x8] sm:$0xff]  }
  0x4a   :  { %v87_v23 = vunpack.c.l.b16 %v79_v21  ;;  %v88_v24 = vunpack.c.l.b16 %v80_v22 }
  0x4b   :  { %411 = vmatpush3.bf16.msra.mxu1 %v433_v19 }
  0x4c   :  { %v90_v25 = vsel %vm89_vm2, %v88_v24, %v87_v23 }
  0x4d   :  { %v91_v26 = vpack.c.b16 %v90_v25, %v90_v25 }
  0x4f   :  { %405 = vmatmul.mubr.msk.bf16.vlgmr.msra.gmra.mrb[0].mxu0 %vm62_vm1, %v91_v26 }
 0x122   :  { %v141_v33 = vpop.f32.mrb[0].mxu0 }
 0x123   :  { %v154_v34 = vrot.slane %v141_v33, %v153_v32  ;;  %v406_v35 = vpop.f32.mrb[1].mxu0 }
 0x124   :  { %v144_v37 = vpop.f32.mrb[2].mxu0 }
 0x125   :  { %v155_v38 = vcombine.high %v154_v34, %v154_v34  ;;  %v162_v39 = vrot.slane %v154_v34, %v153_v32  ;;  %v407_v40 = vpop.f32.mrb[3].mxu0 }
 0x127   :  { %v169_v41 = vrot.slane %v155_v38, %v153_v32  ;;  %v173_v42 = vrot.slane %v162_v39, %v172_v36 }
 0x129   :  { %v180_v43 = vmul.f32 %v173_v42, %v621_v3  ;;  %v177_v44 = vrot.slane %v169_v41, %v172_v36  ;;  %v390_v41 = vld [vmem:[%s665_s3] ss:$0 sm:$0xff]  ;;  %s510_s3 = scalar_lea.vmem %s378_s29, 32 }
 0x12a   :  { %p511_p10 = scmp.ne.s32.totalorder %s378_s29, %s510_s3  ;;  %p516_p12 = scmp.lt.s32.totalorder %s510_s3, %s510_s3 }
 0x12b   :  { %v182_v45 = vsel %vm62_vm1, %v180_v43, 0.0  ;;  %v181_v46 = vmul.f32 %v177_v44, %v623_v4 }
 0x12c   :  { %183 = vadd.xlane.f32.xlu0 %v182_v45  ;;  %p517_p13 = por %p516_p12, %p515_p11 }
 0x12d   :  { %v185_v47 = vsel %vm62_vm1, %v181_v46, 0.0 }
 0x12e   :  { %p518_p0 = pnand %p517_p13, %p511_p10 }
 0x130   :  { %186 = vadd.xlane.f32.xlu0 %v185_v47 }
 0x1b9   :  { %v184_v49 = vpop.xlane.xlu0 %183 }
 0x1ba   :  { %v195_v52 = vrot.slane %v184_v49, %v194_v50 }
 0x1bd   :  { %v187_v51 = vpop.xlane.xlu0 %186 }
 0x1be   :  { %v199_v53 = vrot.slane %v187_v51, %v194_v50 }
 0x1c0   :  { %v200_v54 = vsel %vm89_vm2, %v199_v53, %v195_v52 }
 0x1c1   :  { %v203_v55 = vsel %vm202_vm3, %v200_v54, -inf }
 0x1c2   :  { %204 = vmax.xlane.f32.xlu1 %v203_v55 }
 0x24f   :  { %v205_v58 = vpop.xlane.xlu1 %204 }
 0x250   :  { %v210_v59 = vrot.slane %v205_v58, %v172_v36  ;;  %v214_v60 = vrot.slane %v205_v58, %v213_v57 }
 0x252   :  { %v217_v61 = vsub.f32 %v184_v49, %v210_v59  ;;  %v218_v62 = vsub.f32 %v187_v51, %v214_v60 }
 0x254   :  { %v219_v63 = vmul.f32 1.442695, %v217_v61  ;;  %v221_v1 = vmul.f32 1.442695, %v218_v62 }
 0x256   :  { %434 = vpow2.f32 %v219_v63 }
 0x257   :  { %436 = vpow2.f32 %v221_v1 }
 0x260   :  { %v435_v2 = vpop.eup %434 }
 0x261   :  { %v437_v5 = vpop.eup %436  ;;  %226 = vperm.xlu1 %428, %v435_v2  }
 0x262   :  { %229 = vperm.xlu0 %429, %v437_v5  }
 0x2e0   :  { %v227_v6 = vpop.permute.xlu1 %226 }
 0x2e1   :  { %v230_v7 = vpop.permute.xlu0 %229  ;;  %v234_v8 = vrot.slane %v227_v6, %v194_v50 }
 0x2e2   :  { %v238_v9 = vrot.slane %v230_v7, %v194_v50 }
 0x2e4   :  { %v239_v10 = vsel %vm89_vm2, %v238_v9, %v234_v8 }
 0x2e5   :  { %v241_v11 = vsel %vm202_vm3, %v239_v10, 0.0 }
 0x2e6   :  { %242 = vadd.xlane.f32.xlu1 %v241_v11 }
 0x373   :  { %v243_v12 = vpop.xlane.xlu1 %242 }
 0x374   :  { %438 = vrcp.f32 %v243_v12 }
 0x37e   :  { %v439_v13 = vpop.eup %438 }
 0x37f   :  { %v249_v14 = vrot.slane %v439_v13, %v172_v36  ;;  %v253_v16 = vrot.slane %v439_v13, %v213_v57 }
 0x381   :  { %v256_v15 = vmul.f32 %v435_v2, %v249_v14  ;;  %v257_v17 = vmul.f32 %v437_v5, %v253_v16 }
 0x383   :  { %260 = vperm.xlu0 %429, %v256_v15  }
 0x387   :  { %265 = vperm.xlu0 %429, %v257_v17  }
 0x402   :  { %v261_v20 = vpop.permute.xlu0 %260 }
 0x403   :  { %v268_v21 = vmul.f32 %v261_v20, %v621_v3 }
 0x405   :  { %v270_v22 = vsel %vm62_vm1, %v268_v21, 0.0 }
 0x406   :  { %v271_v23 = vrot.slane %v270_v22, 4  ;;  %v266_v24 = vpop.permute.xlu0 %265 }
 0x407   :  { %v269_v25 = vmul.f32 %v266_v24, %v623_v4 }
 0x408   :  { %v272_v26 = vadd.f32 %v271_v23, %v270_v22 }
 0x409   :  { %v277_v27 = vsel %vm62_vm1, %v269_v25, 0.0 }
 0x40a   :  { %v273_v28 = vrot.slane %v272_v26, 2  ;;  %v278_v29 = vrot.slane %v277_v27, 4 }
 0x40c   :  { %v274_v30 = vadd.f32 %v273_v28, %v272_v26  ;;  %v279_v31 = vadd.f32 %v278_v29, %v277_v27 }
 0x40e   :  { %v275_v32 = vrot.slane %v274_v30, 1  ;;  %v280_v0 = vrot.slane %v279_v31, 2 }
 0x410   :  { %v276_v33 = vadd.f32 %v275_v32, %v274_v30  ;;  %v281_v34 = vadd.f32 %v280_v0, %v279_v31 }
 0x412   :  { %v282_v35 = vrot.slane %v281_v34, 1  ;;  %v284_v36 = vpack.c.bf16 %v276_v33, %v276_v33 }
 0x414   :  { %v283_v3 = vadd.f32 %v282_v35, %v281_v34  ;;  %v299_v38 = vunpack.c.l.b16 %v284_v36 }
 0x416   :  { %v285_v37 = vpack.c.bf16 %v283_v3, %v283_v3 }
 0x418   :  { %v300_v39 = vunpack.c.l.b16 %v285_v37 }
 0x41a   :  { %v301_v40 = vsel %vm89_vm2, %v300_v39, %v299_v38 }
 0x41b   :  { %v302_v4 = vpack.c.b16 %v301_v40, %v301_v40 }
 0x41d   :  { %413 = vmatmul.mubr.msk.bf16.vlgmr.msra.gmra.mrb[0].mxu1 %vm62_vm1, %v302_v4 }
 0x4f0   :  { %v352_v42 = vpop.f32.mrb[0].mxu1 }
 0x4f1   :  { %v353_v43 = vadd.f32 %v390_v41, %v352_v42  ;;  %v414_v44 = vpop.f32.mrb[1].mxu1 }
 0x4f2   :  { %v355_v45 = vpop.f32.mrb[2].mxu1 }
 0x4f3   :  { %v415_v46 = vpop.f32.mrb[3].mxu1  ;;  %v359_v47 = vsel %vm358_vm4, %v353_v43, -inf }
 0x4f4   :  { %360 = vmax.xlane.f32.xlu1 %v359_v47 }
 0x581   :  { %v361_v48 = vpop.xlane.xlu1 %360 }
 0x582   :  { %v362_v49 = vsub.f32 %v353_v43, %v361_v48 }
 0x584   :  { %v363_v50 = vmul.f32 1.442695, %v362_v49 }
 0x586   :  { %440 = vpow2.f32 %v363_v50 }
 0x590   :  { %v441_v51 = vpop.eup %440 }
 0x591   :  { %v365_v52 = vsel %vm358_vm4, %v441_v51, 0.0 }
 0x592   :  { %366 = vadd.xlane.f32.xlu0 %v365_v52 }
 0x61f   :  { %v367_v53 = vpop.xlane.xlu0 %366 }
 0x620   :  { %442 = vrcp.f32 %v367_v53 }
 0x62a   :  { %v443_v54 = vpop.eup %442 }
 0x62b   :  { %v369_v55 = vmul.f32 %v443_v54, %v441_v51 }
 0x62d   :  { %370 = vst [vmem:[#allocation8] sm:$0x3] %v369_v55 }
 0x62e   :  { %521 = shalt.err (!%p518_p0)
}
 0x62f   :  { %s522_s6 = scalar_lea.hbm %s666_s4, 32 }
 0x630   :  { %p523_p1 = scmp.ne.s32.totalorder %s666_s4, %s522_s6  ;;  %p526_p2 = scmp.lt.u32.totalorder %s522_s6, %s666_s4 }
 0x632   :  { %p528_p3 = pnand %p526_p2, %p523_p1 }
 0x634   :  { %531 = shalt.err (!%p528_p3)
}
 0x635   :  { %380 = dma.vmem_to_hbm [thread:$0]  %s378_s29, 32, %s666_s4, [#allocation4]  }
 0x636   :  { %536 = dma.done.wait [#allocation4], 32  }
 0x637   :  { %537 = vsyncadd [#allocation4], 4294967264 }
 0x638   :  { %384 = vsyncpa [#allocation3], 1 }
 0x639   :  { %385 = vsyncpa [#allocation6], 1 }
 0x63a   :  { %386 = vsyncpa [#allocation4], 1 }

</bundles_post_ra>
